<compile_context>
chip_gen: v6e
topology: v6e:2x2x1
jax: 0.10.0
libtpu: 0.0.40
codegen_flags: <defaults>
</compile_context>

<pallas_src>
import jax
import jax.numpy as jnp
import numpy as np
from jax.experimental import pallas as pl
from jax.experimental.pallas import tpu as pltpu


def _round_up(v, m):
    return (v + m - 1) // m * m


# ---------------------------------------------------------------------------
# Kernels
# ---------------------------------------------------------------------------

def _glu_stats_kernel(x_ref, w1p_ref, w1q_ref, s1_ref, s2_ref):
    """Pass 1: GLU on this lane tile + per-row partial BN sums (disjoint output)."""
    x = x_ref[...]                                                      # (R, tile_nn)
    # Temporal conv: value half (residual + bias folded in) and gate half, each
    # as one MXU dot straight from the input tile (no im2col scratch).
    p = jnp.dot(w1p_ref[...], x, preferred_element_type=jnp.float32)   # (CT, tile_nn)
    q = jnp.dot(w1q_ref[...], x, preferred_element_type=jnp.float32)   # (CT, tile_nn)
    glu = p * jax.nn.sigmoid(q)
    # Pad lanes of x are all-zero (including the constant-1 bias row), so glu is
    # exactly zero there: no mask needed, the wrapper divides by the true count.
    s1_ref[...] = jnp.sum(glu, axis=1, keepdims=True)[None]            # (1, CT, 1)
    s2_ref[...] = jnp.sum(glu * glu, axis=1, keepdims=True)[None]      # (1, CT, 1)


def _apply_kernel(x_ref, w1p_ref, w1q_ref, w2_ref, b2_ref, w3_ref, b3_ref, out_ref):
    """Pass 2: GLU -> (BN folded into conv2) -> sigmoid -> fc, all on the MXU."""
    x = x_ref[...]                                                      # (R, tile_nn)
    p = jnp.dot(w1p_ref[...], x, preferred_element_type=jnp.float32)
    q = jnp.dot(w1q_ref[...], x, preferred_element_type=jnp.float32)
    glu = p * jax.nn.sigmoid(q)                                         # (CT, tile_nn)
    # BatchNorm scale/shift is folded into w2/b2 by the wrapper.
    h = jax.nn.sigmoid(
        jnp.dot(w2_ref[...], glu, preferred_element_type=jnp.float32) + b2_ref[...])
    out_ref[...] = (
        jnp.dot(w3_ref[...], h, preferred_element_type=jnp.float32) + b3_ref[...])


# ---------------------------------------------------------------------------
# Wrapper
# ---------------------------------------------------------------------------

def output_layer_forward(x_nchw, params):
    """Pallas forward of output_layer.  x_nchw: (N, C, T, n) -> (N, 1, T, n)."""
    N, C, T, n = x_nchw.shape
    kt = T                           # module constructs temporal_conv_layer1 with kt == T
    pt = (kt - 1) // 2
    Tp = T + kt - 1
    CT = C * T
    Nn = N * n
    eps = 1e-5
    f32 = jnp.float32

    # Lane tiling over positions (grid axis, "parallel"); rows hold (time, ch).
    tile_nn = min(1024, _round_up(Nn, 128))
    Nnp = _round_up(Nn, tile_nn)
    n_tiles = Nnp // tile_nn
    R = _round_up(Tp * C + 1, 8)     # +1 constant-one row for the folded biases

    # ---- input layout: (time-padded (t,c) rows + bias row, padded lanes) ----
    # TODO(synk): this transpose/pad is one extra HBM round trip; the upstream
    # producer could emit the (Tp*C+1, Nn) layout directly.
    xt = jnp.transpose(x_nchw, (2, 1, 0, 3)).astype(f32).reshape(T * C, Nn)
    xrows = jnp.zeros((R, Nnp), f32)
    xrows = xrows.at[pt * C:(pt + T) * C, :Nn].set(xt)
    xrows = xrows.at[Tp * C, :Nn].set(1.0)       # bias row (valid lanes only)

    # ---- conv1 as two (C*T, R) Toeplitz matrices (value / gate halves) ------
    # TODO(synk): keep weights/input in bf16 for the dots on v6e/v7x once the
    # 1e-3 tolerance is re-validated; kept f32 here for accuracy.
    w1 = params["w1"].astype(f32)                # (kt, C, 2C): [k, ci, co]
    b1 = params["b1"].astype(f32)
    t_idx = jnp.arange(T)
    Ap = jnp.zeros((C, T, Tp, C), f32)           # [co, t_out, t_pad, ci]
    Aq = jnp.zeros((C, T, Tp, C), f32)
    for k in range(kt):                          # kt is small & static
        Ap = Ap.at[:, t_idx, t_idx + k, :].add(w1[k, :, :C].T[:, None, :])
        Aq = Aq.at[:, t_idx, t_idx + k, :].add(w1[k, :, C:].T[:, None, :])
    # GLU residual (x_input) folded into the value half.
    Ap = Ap.at[:, t_idx, t_idx + pt, :].add(jnp.eye(C, dtype=f32)[:, None, :])
    zpad = jnp.zeros((CT, R - Tp * C - 1), f32)
    w1p = jnp.concatenate(
        [Ap.reshape(CT, Tp * C), jnp.repeat(b1[:C], T)[:, None], zpad], axis=1)
    w1q = jnp.concatenate(
        [Aq.reshape(CT, Tp * C), jnp.repeat(b1[C:], T)[:, None], zpad], axis=1)

    # Explicit VMEM budget (double-buffered pipelined blocks + resident weights).
    blk_bytes = 4 * (R * tile_nn + T * tile_nn)
    w_bytes = 4 * (2 * CT * R + CT * CT + CT + T * CT + 1)
    vmem_limit = int(min(max(4 * (2 * blk_bytes + w_bytes), 8 << 20), 64 << 20))
    cparams = pltpu.CompilerParams(
        dimension_semantics=("parallel",), vmem_limit_bytes=vmem_limit)

    # ---- pass 1: disjoint per-tile partial BN statistics --------------------
    stats1, stats2 = pl.pallas_call(
        _glu_stats_kernel,
        out_shape=(jax.ShapeDtypeStruct((n_tiles, CT, 1), f32),
                   jax.ShapeDtypeStruct((n_tiles, CT, 1), f32)),
        grid=(n_tiles,),
        in_specs=[pl.BlockSpec((R, tile_nn), lambda i: (0, i)),
                  pl.BlockSpec((CT, R), lambda i: (0, 0)),
                  pl.BlockSpec((CT, R), lambda i: (0, 0))],
        out_specs=(pl.BlockSpec((1, CT, 1), lambda i: (i, 0, 0)),
                   pl.BlockSpec((1, CT, 1), lambda i: (i, 0, 0))),
        compiler_params=cparams,
    )(xrows, w1p, w1q)

    count = float(N * T * n)
    s1 = jnp.sum(stats1[:, :, 0], axis=0).reshape(C, T).sum(axis=1)
    s2 = jnp.sum(stats2[:, :, 0], axis=0).reshape(C, T).sum(axis=1)
    mean = s1 / count
    # TODO(synk): one-pass E[x^2]-E[x]^2 can cancel for large-mean activations;
    # switch to a shifted / two-pass variance if that regime matters.
    var = jnp.maximum(s2 / count - mean * mean, 0.0)
    scale = params["gamma"].astype(f32) * jax.lax.rsqrt(var + eps)
    shift = params["beta"].astype(f32) - mean * scale
    # TODO(synk): running_mean/running_var updates (stateful in PyTorch) omitted.

    # ---- fold BN into the 1x1 sigmoid conv; expand to the (C*T) row space ---
    w2t = params["w2"].astype(f32).T                     # [co, ci]
    w2s = w2t * scale[None, :]
    b2eff = w2t @ shift + params["b2"].astype(f32)
    eye_t = jnp.eye(T, dtype=f32)
    w2big = jnp.einsum("oi,tu->otiu", w2s, eye_t).reshape(CT, CT)
    b2col = jnp.repeat(b2eff, T)[:, None]                # (CT, 1)
    w3big = jnp.einsum("o,tu->tou",
                       params["w3"].astype(f32)[:, 0], eye_t).reshape(T, CT)
    b3 = params["b3"].astype(f32).reshape(1, 1)

    # ---- pass 2: apply (GLU recomputed; conv2 + fc on the MXU) ---------------
    out_rows = pl.pallas_call(
        _apply_kernel,
        out_shape=jax.ShapeDtypeStruct((T, Nnp), f32),
        grid=(n_tiles,),
        in_specs=[pl.BlockSpec((R, tile_nn), lambda i: (0, i)),
                  pl.BlockSpec((CT, R), lambda i: (0, 0)),
                  pl.BlockSpec((CT, R), lambda i: (0, 0)),
                  pl.BlockSpec((CT, CT), lambda i: (0, 0)),
                  pl.BlockSpec((CT, 1), lambda i: (0, 0)),
                  pl.BlockSpec((T, CT), lambda i: (0, 0)),
                  pl.BlockSpec((1, 1), lambda i: (0, 0))],
        out_specs=pl.BlockSpec((T, tile_nn), lambda i: (0, i)),
        compiler_params=cparams,
    )(xrows, w1p, w1q, w2big, b2col, w3big, b3)

    # (T, Nnp) -> drop pad lanes -> PyTorch NCHW (N, 1, T, n).
    out = out_rows[:, :Nn].reshape(T, N, n)
    return jnp.transpose(out, (1, 0, 2))[:, None, :, :]


# ---------------------------------------------------------------------------
# Pure-JAX reference (mirrors the PyTorch forward, training-mode BatchNorm)
# ---------------------------------------------------------------------------

def output_layer_reference(x_nchw, params):
    N, C, T, n = x_nchw.shape
    pt = (T - 1) // 2
    pb = (T - 1) - pt
    w1 = params["w1"]                                     # (T, C, 2C)
    W1 = jnp.transpose(w1, (2, 1, 0))[..., None]          # OIHW (2C, C, T, 1)
    xpad = jnp.pad(x_nchw, ((0, 0), (0, 0), (pt, pb), (0, 0)))
    conv1 = jax.lax.conv_general_dilated(
        xpad, W1, (1, 1), "VALID",
        dimension_numbers=("NCHW", "OIHW", "NCHW"),
        precision=jax.lax.Precision.HIGHEST,
    ) + params["b1"].reshape(1, 2 * C, 1, 1)
    glu = (conv1[:, :C] + x_nchw) * jax.nn.sigmoid(conv1[:, C:])
    mean = glu.mean(axis=(0, 2, 3), keepdims=True)
    var = ((glu - mean) ** 2).mean(axis=(0, 2, 3), keepdims=True)
    bn = (glu - mean) / jnp.sqrt(var + 1e-5)
    bn = bn * params["gamma"].reshape(1, C, 1, 1) + params["beta"].reshape(1, C, 1, 1)
    h = jax.nn.sigmoid(
        jnp.einsum("nchw,cd->ndhw", bn, params["w2"],
                   precision=jax.lax.Precision.HIGHEST)
        + params["b2"].reshape(1, C, 1, 1)
    )
    out = jnp.einsum("nchw,cd->ndhw", h, params["w3"],
                     precision=jax.lax.Precision.HIGHEST)
    return out + params["b3"].reshape(1, 1, 1, 1)


if __name__ == "__main__":
    # output_layer(T=8, n=16, channel=4); x is NCHW = (batch, channel, T, n).
    N, C, T, n = 2, 4, 8, 16
    key = jax.random.PRNGKey(0)
    ks = jax.random.split(key, 8)
    x = jax.random.normal(ks[0], (N, C, T, n), jnp.float32)
    params = {
        "w1": 0.3 * jax.random.normal(ks[1], (T, C, 2 * C), jnp.float32),  # GLU conv
        "b1": 0.1 * jax.random.normal(ks[2], (2 * C,), jnp.float32),
        "gamma": jnp.ones((C,), jnp.float32),    # BatchNorm2d default init
        "beta": jnp.zeros((C,), jnp.float32),
        "w2": 0.3 * jax.random.normal(ks[3], (C, C), jnp.float32),         # 1x1 conv
        "b2": 0.1 * jax.random.normal(ks[4], (C,), jnp.float32),
        "w3": 0.3 * jax.random.normal(ks[5], (C, 1), jnp.float32),         # fc conv
        "b3": 0.1 * jax.random.normal(ks[6], (1,), jnp.float32),
    }

    fwd = jax.jit(output_layer_forward)
    out = jax.block_until_ready(fwd(x, params))
    ref = jax.block_until_ready(output_layer_reference(x, params))
    assert out.shape == (N, 1, T, n), out.shape
    np.testing.assert_allclose(np.asarray(out), np.asarray(ref), atol=1e-3, rtol=1e-3)
    print("KERNEL_OK")
</pallas_src>

<mosaic_0001>
module attributes {stable_mosaic.version = 11 : i64} {
  func.func @_glu_stats_kernel(%arg0: i32, %arg1: memref<64x128xf32, #tpu.memory_space<vmem>>, %arg2: memref<32x64xf32, #tpu.memory_space<vmem>>, %arg3: memref<32x64xf32, #tpu.memory_space<vmem>>, %arg4: memref<1x32x1xf32, #tpu.memory_space<vmem>>, %arg5: memref<1x32x1xf32, #tpu.memory_space<vmem>>) attributes {dimension_semantics = [#tpu.dimension_semantics<parallel>], iteration_bounds = array<i64: 1>, scalar_prefetch = 0 : i64, scratch_operands = 0 : i64, tpu.core_type = #tpu.core_type<tc>, window_params = [{transform_indices = @transform_0, window_bounds = array<i64: 64, 128>}, {pipeline_mode = #tpu.pipeline_mode<synchronous>, transform_indices = @transform_1, window_bounds = array<i64: 32, 64>}, {pipeline_mode = #tpu.pipeline_mode<synchronous>, transform_indices = @transform_2, window_bounds = array<i64: 32, 64>}, {transform_indices = @transform_3, window_bounds = array<i64: 1, 32, 1>}, {transform_indices = @transform_4, window_bounds = array<i64: 1, 32, 1>}]} {
    %c0 = arith.constant 0 : index
    %c0_0 = arith.constant 0 : index
    %0 = vector.load %arg1[%c0, %c0_0] : memref<64x128xf32, #tpu.memory_space<vmem>>, vector<64x128xf32>
    %c0_1 = arith.constant 0 : index
    %c0_2 = arith.constant 0 : index
    %1 = vector.load %arg2[%c0_1, %c0_2] : memref<32x64xf32, #tpu.memory_space<vmem>>, vector<32x64xf32>
    %cst = arith.constant dense<0.000000e+00> : vector<32x128xf32>
    %2 = tpu.matmul %1, %0, %cst {dimension_numbers = #tpu.dot_dimension_numbers<[1], [0], [0], [1], [0, 0, 1, 1], [], []>} : vector<32x64xf32>, vector<64x128xf32>, vector<32x128xf32> -> vector<32x128xf32>
    %c0_3 = arith.constant 0 : index
    %c0_4 = arith.constant 0 : index
    %3 = vector.load %arg3[%c0_3, %c0_4] : memref<32x64xf32, #tpu.memory_space<vmem>>, vector<32x64xf32>
    %cst_5 = arith.constant dense<0.000000e+00> : vector<32x128xf32>
    %4 = tpu.matmul %3, %0, %cst_5 {dimension_numbers = #tpu.dot_dimension_numbers<[1], [0], [0], [1], [0, 0, 1, 1], [], []>} : vector<32x64xf32>, vector<64x128xf32>, vector<32x128xf32> -> vector<32x128xf32>
    %5 = arith.negf %4 : vector<32x128xf32>
    %6 = math.exp %5 : vector<32x128xf32>
    %cst_6 = arith.constant 1.000000e+00 : f32
    %7 = vector.broadcast %cst_6 : f32 to vector<32x128xf32>
    %8 = arith.addf %7, %6 : vector<32x128xf32>
    %9 = arith.divf %7, %8 : vector<32x128xf32>
    %10 = arith.mulf %2, %9 : vector<32x128xf32>
    %cst_7 = arith.constant dense<0.000000e+00> : vector<32xf32>
    %11 = vector.multi_reduction <add>, %10, %cst_7 [1] : vector<32x128xf32> to vector<32xf32>
    %12 = vector.shape_cast %11 : vector<32xf32> to vector<32x1xf32>
    %13 = vector.shape_cast %12 : vector<32x1xf32> to vector<1x32x1xf32>
    %c0_8 = arith.constant 0 : index
    %c0_9 = arith.constant 0 : index
    %c0_10 = arith.constant 0 : index
    %14 = vector.load %arg4[%c0_8, %c0_9, %c0_10] : memref<1x32x1xf32, #tpu.memory_space<vmem>>, vector<1x32x1xf32>
    tpu.vector_store %arg4[%c0_8, %c0_9, %c0_10], %13 {strides = array<i32>} : memref<1x32x1xf32, #tpu.memory_space<vmem>>, vector<1x32x1xf32>,
    %15 = arith.mulf %10, %10 : vector<32x128xf32>
    %cst_11 = arith.constant dense<0.000000e+00> : vector<32xf32>
    %16 = vector.multi_reduction <add>, %15, %cst_11 [1] : vector<32x128xf32> to vector<32xf32>
    %17 = vector.shape_cast %16 : vector<32xf32> to vector<32x1xf32>
    %18 = vector.shape_cast %17 : vector<32x1xf32> to vector<1x32x1xf32>
    %c0_12 = arith.constant 0 : index
    %c0_13 = arith.constant 0 : index
    %c0_14 = arith.constant 0 : index
    %19 = vector.load %arg5[%c0_12, %c0_13, %c0_14] : memref<1x32x1xf32, #tpu.memory_space<vmem>>, vector<1x32x1xf32>
    tpu.vector_store %arg5[%c0_12, %c0_13, %c0_14], %18 {strides = array<i32>} : memref<1x32x1xf32, #tpu.memory_space<vmem>>, vector<1x32x1xf32>,
    return
  }
  func.func @transform_0(%arg0: i32) -> (i32, i32) {
    %c0_i32 = arith.constant 0 : i32
    %c0_i32_0 = arith.constant 0 : i32
    return %c0_i32, %arg0 : i32, i32
  }
  func.func @transform_1(%arg0: i32) -> (i32, i32) {
    %c0_i32 = arith.constant 0 : i32
    %c0_i32_0 = arith.constant 0 : i32
    %c0_i32_1 = arith.constant 0 : i32
    return %c0_i32, %c0_i32_0 : i32, i32
  }
  func.func @transform_2(%arg0: i32) -> (i32, i32) {
    %c0_i32 = arith.constant 0 : i32
    %c0_i32_0 = arith.constant 0 : i32
    %c0_i32_1 = arith.constant 0 : i32
    return %c0_i32, %c0_i32_0 : i32, i32
  }
  func.func @transform_3(%arg0: i32) -> (i32, i32, i32) {
    %c0_i32 = arith.constant 0 : i32
    %c0_i32_0 = arith.constant 0 : i32
    %c0_i32_1 = arith.constant 0 : i32
    return %arg0, %c0_i32, %c0_i32_0 : i32, i32, i32
  }
  func.func @transform_4(%arg0: i32) -> (i32, i32, i32) {
    %c0_i32 = arith.constant 0 : i32
    %c0_i32_0 = arith.constant 0 : i32
    %c0_i32_1 = arith.constant 0 : i32
    return %arg0, %c0_i32, %c0_i32_0 : i32, i32, i32
  }
}

module attributes {stable_mosaic.version = 11 : i64} {
  func.func @_apply_kernel(%arg0: i32, %arg1: memref<64x128xf32, #tpu.memory_space<vmem>>, %arg2: memref<32x64xf32, #tpu.memory_space<vmem>>, %arg3: memref<32x64xf32, #tpu.memory_space<vmem>>, %arg4: memref<32x32xf32, #tpu.memory_space<vmem>>, %arg5: memref<32x1xf32, #tpu.memory_space<vmem>>, %arg6: memref<8x32xf32, #tpu.memory_space<vmem>>, %arg7: memref<1x1xf32, #tpu.memory_space<vmem>>, %arg8: memref<8x128xf32, #tpu.memory_space<vmem>>) attributes {dimension_semantics = [#tpu.dimension_semantics<parallel>], iteration_bounds = array<i64: 1>, scalar_prefetch = 0 : i64, scratch_operands = 0 : i64, tpu.core_type = #tpu.core_type<tc>, window_params = [{transform_indices = @transform_0, window_bounds = array<i64: 64, 128>}, {pipeline_mode = #tpu.pipeline_mode<synchronous>, transform_indices = @transform_1, window_bounds = array<i64: 32, 64>}, {pipeline_mode = #tpu.pipeline_mode<synchronous>, transform_indices = @transform_2, window_bounds = array<i64: 32, 64>}, {pipeline_mode = #tpu.pipeline_mode<synchronous>, transform_indices = @transform_3, window_bounds = array<i64: 32, 32>}, {pipeline_mode = #tpu.pipeline_mode<synchronous>, transform_indices = @transform_4, window_bounds = array<i64: 32, 1>}, {pipeline_mode = #tpu.pipeline_mode<synchronous>, transform_indices = @transform_5, window_bounds = array<i64: 8, 32>}, {pipeline_mode = #tpu.pipeline_mode<synchronous>, transform_indices = @transform_6, window_bounds = array<i64: 1, 1>}, {transform_indices = @transform_7, window_bounds = array<i64: 8, 128>}]} {
    %c0 = arith.constant 0 : index
    %c0_0 = arith.constant 0 : index
    %0 = vector.load %arg1[%c0, %c0_0] : memref<64x128xf32, #tpu.memory_space<vmem>>, vector<64x128xf32>
    %c0_1 = arith.constant 0 : index
    %c0_2 = arith.constant 0 : index
    %1 = vector.load %arg2[%c0_1, %c0_2] : memref<32x64xf32, #tpu.memory_space<vmem>>, vector<32x64xf32>
    %cst = arith.constant dense<0.000000e+00> : vector<32x128xf32>
    %2 = tpu.matmul %1, %0, %cst {dimension_numbers = #tpu.dot_dimension_numbers<[1], [0], [0], [1], [0, 0, 1, 1], [], []>} : vector<32x64xf32>, vector<64x128xf32>, vector<32x128xf32> -> vector<32x128xf32>
    %c0_3 = arith.constant 0 : index
    %c0_4 = arith.constant 0 : index
    %3 = vector.load %arg3[%c0_3, %c0_4] : memref<32x64xf32, #tpu.memory_space<vmem>>, vector<32x64xf32>
    %cst_5 = arith.constant dense<0.000000e+00> : vector<32x128xf32>
    %4 = tpu.matmul %3, %0, %cst_5 {dimension_numbers = #tpu.dot_dimension_numbers<[1], [0], [0], [1], [0, 0, 1, 1], [], []>} : vector<32x64xf32>, vector<64x128xf32>, vector<32x128xf32> -> vector<32x128xf32>
    %5 = arith.negf %4 : vector<32x128xf32>
    %6 = math.exp %5 : vector<32x128xf32>
    %cst_6 = arith.constant 1.000000e+00 : f32
    %7 = vector.broadcast %cst_6 : f32 to vector<32x128xf32>
    %8 = arith.addf %7, %6 : vector<32x128xf32>
    %9 = arith.divf %7, %8 : vector<32x128xf32>
    %10 = arith.mulf %2, %9 : vector<32x128xf32>
    %c0_7 = arith.constant 0 : index
    %c0_8 = arith.constant 0 : index
    %11 = vector.load %arg4[%c0_7, %c0_8] : memref<32x32xf32, #tpu.memory_space<vmem>>, vector<32x32xf32>
    %cst_9 = arith.constant dense<0.000000e+00> : vector<32x128xf32>
    %12 = tpu.matmul %11, %10, %cst_9 {dimension_numbers = #tpu.dot_dimension_numbers<[1], [0], [0], [1], [0, 0, 1, 1], [], []>} : vector<32x32xf32>, vector<32x128xf32>, vector<32x128xf32> -> vector<32x128xf32>
    %c0_10 = arith.constant 0 : index
    %c0_11 = arith.constant 0 : index
    %13 = vector.load %arg5[%c0_10, %c0_11] : memref<32x1xf32, #tpu.memory_space<vmem>>, vector<32x1xf32>
    %14 = vector.broadcast %13 : vector<32x1xf32> to vector<32x128xf32>
    %15 = arith.addf %12, %14 : vector<32x128xf32>
    %16 = arith.negf %15 : vector<32x128xf32>
    %17 = math.exp %16 : vector<32x128xf32>
    %cst_12 = arith.constant 1.000000e+00 : f32
    %18 = vector.broadcast %cst_12 : f32 to vector<32x128xf32>
    %19 = arith.addf %18, %17 : vector<32x128xf32>
    %20 = arith.divf %18, %19 : vector<32x128xf32>
    %c0_13 = arith.constant 0 : index
    %c0_14 = arith.constant 0 : index
    %21 = vector.load %arg6[%c0_13, %c0_14] : memref<8x32xf32, #tpu.memory_space<vmem>>, vector<8x32xf32>
    %cst_15 = arith.constant dense<0.000000e+00> : vector<8x128xf32>
    %22 = tpu.matmul %21, %20, %cst_15 {dimension_numbers = #tpu.dot_dimension_numbers<[1], [0], [0], [1], [0, 0, 1, 1], [], []>} : vector<8x32xf32>, vector<32x128xf32>, vector<8x128xf32> -> vector<8x128xf32>
    %c0_16 = arith.constant 0 : index
    %c0_17 = arith.constant 0 : index
    %23 = vector.load %arg7[%c0_16, %c0_17] : memref<1x1xf32, #tpu.memory_space<vmem>>, vector<1x1xf32>
    %24 = vector.broadcast %23 : vector<1x1xf32> to vector<8x128xf32>
    %25 = arith.addf %22, %24 : vector<8x128xf32>
    %c0_18 = arith.constant 0 : index
    %c0_19 = arith.constant 0 : index
    %26 = vector.load %arg8[%c0_18, %c0_19] : memref<8x128xf32, #tpu.memory_space<vmem>>, vector<8x128xf32>
    tpu.vector_store %arg8[%c0_18, %c0_19], %25 {strides = array<i32>} : memref<8x128xf32, #tpu.memory_space<vmem>>, vector<8x128xf32>,
    return
  }
  func.func @transform_0(%arg0: i32) -> (i32, i32) {
    %c0_i32 = arith.constant 0 : i32
    %c0_i32_0 = arith.constant 0 : i32
    return %c0_i32, %arg0 : i32, i32
  }
  func.func @transform_1(%arg0: i32) -> (i32, i32) {
    %c0_i32 = arith.constant 0 : i32
    %c0_i32_0 = arith.constant 0 : i32
    %c0_i32_1 = arith.constant 0 : i32
    return %c0_i32, %c0_i32_0 : i32, i32
  }
  func.func @transform_2(%arg0: i32) -> (i32, i32) {
    %c0_i32 = arith.constant 0 : i32
    %c0_i32_0 = arith.constant 0 : i32
    %c0_i32_1 = arith.constant 0 : i32
    return %c0_i32, %c0_i32_0 : i32, i32
  }
  func.func @transform_3(%arg0: i32) -> (i32, i32) {
    %c0_i32 = arith.constant 0 : i32
    %c0_i32_0 = arith.constant 0 : i32
    %c0_i32_1 = arith.constant 0 : i32
    return %c0_i32, %c0_i32_0 : i32, i32
  }
  func.func @transform_4(%arg0: i32) -> (i32, i32) {
    %c0_i32 = arith.constant 0 : i32
    %c0_i32_0 = arith.constant 0 : i32
    %c0_i32_1 = arith.constant 0 : i32
    return %c0_i32, %c0_i32_0 : i32, i32
  }
  func.func @transform_5(%arg0: i32) -> (i32, i32) {
    %c0_i32 = arith.constant 0 : i32
    %c0_i32_0 = arith.constant 0 : i32
    %c0_i32_1 = arith.constant 0 : i32
    return %c0_i32, %c0_i32_0 : i32, i32
  }
  func.func @transform_6(%arg0: i32) -> (i32, i32) {
    %c0_i32 = arith.constant 0 : i32
    %c0_i32_0 = arith.constant 0 : i32
    %c0_i32_1 = arith.constant 0 : i32
    return %c0_i32, %c0_i32_0 : i32, i32
  }
  func.func @transform_7(%arg0: i32) -> (i32, i32) {
    %c0_i32 = arith.constant 0 : i32
    %c0_i32_0 = arith.constant 0 : i32
    return %c0_i32, %arg0 : i32, i32
  }
}

</mosaic_0001>

<bundles_post_ra>
// kernel: output_layer_forward.2
= control target key start
LH: loop header
LB: loop body
LE: loop exit
PB: predicated region body
PF: predicated region fallthrough
CT: control target
= control target key end

     0   :  { %vm28_vm0 = vcmask 523264   ;;  %vm263_vm1 = vcmask 7168   ;;  %s501_s0 = inlined_call_operand.vmem [shape: f32[64,128], index: 0, kind: input, shape index: {}]   ;;  %s502_s2 = inlined_call_operand.vmem [shape: f32[32,64], index: 2, kind: input, shape index: {}]   ;;  %s503_s1 = inlined_call_operand.vmem [shape: f32[32,64], index: 1, kind: input, shape index: {}]   ;;  %s504_s3 = inlined_call_operand.vmem [shape: f32[1,32,1], index: 3, kind: output, shape index: {0}]   ;;  %s505_s4 = inlined_call_operand.vmem [shape: f32[1,32,1], index: 4, kind: output, shape index: {1}]  }
   0x1   :  { %v23_v0 = vld [vmem:[%s501_s0 + $0x38] sm:$0xff]  ;;  %v22_v1 = vld [vmem:[%s501_s0 + $0x30] sm:$0xff]  ;;  %v21_v2 = vld [vmem:[%s501_s0 + $0x28] sm:$0xff] }
   0x2   :  { %350 = vmatprep.subr.mxu1 %v23_v0  ;;  %328 = vmatprep.subr.mxu0 %v23_v0  ;;  %v126_v3 = vld [vmem:[%s502_s2] sm:$0xff]  ;;  %v19_v5 = vld [vmem:[%s501_s0 + $0x18] sm:$0xff]  ;;  %v18_v6 = vld [vmem:[%s501_s0 + $0x10] sm:$0xff] }
   0x3   :  { %351 = vmatpush3.msra.mxu1 %v23_v0  ;;  %329 = vmatpush3.msra.mxu0 %v23_v0  ;;  %v20_v4 = vld [vmem:[%s501_s0 + $0x20] sm:$0xff]  ;;  %v17_v7 = vld [vmem:[%s501_s0 + $0x8] sm:$0xff]  ;;  %v128_v10 = vld [vmem:[%s502_s2 + $0x10] sm:$0xff] }
   0x4   :  { %352 = vmatprep.subr.mxu1 %v22_v1  ;;  %366 = vmatprep.mubr.msk.f32.mxu1 %vm28_vm0, %v126_v3  ;;  %v16_v8 = vld [vmem:[%s501_s0] sm:$0xff]  ;;  %v127_v9 = vld [vmem:[%s502_s2 + $0x8] sm:$0xff]  ;;  %v26_v13 = vld [vmem:[%s503_s1 + $0x10] sm:$0xff] }
   0x5   :  { %353 = vmatpush3.msra.mxu1 %v22_v1  ;;  %330 = vmatprep.subr.mxu0 %v22_v1  ;;  %v24_v11 = vld [vmem:[%s503_s1] sm:$0xff]  ;;  %v25_v12 = vld [vmem:[%s503_s1 + $0x8] sm:$0xff]  ;;  %v129_v14 = vld [vmem:[%s502_s2 + $0x18] sm:$0xff] }
   0x6   :  { %354 = vmatprep.subr.mxu1 %v21_v2  ;;  %331 = vmatpush3.msra.mxu0 %v22_v1  ;;  %v27_v15 = vld [vmem:[%s503_s1 + $0x18] sm:$0xff] }
   0x7   :  { %355 = vmatpush3.msra.mxu1 %v21_v2  ;;  %332 = vmatprep.subr.mxu0 %v21_v2 }
   0x8   :  { %356 = vmatprep.subr.mxu1 %v20_v4  ;;  %333 = vmatpush3.msra.mxu0 %v21_v2 }
   0x9   :  { %357 = vmatpush3.msra.mxu1 %v20_v4  ;;  %334 = vmatprep.subr.mxu0 %v20_v4 }
   0xa   :  { %358 = vmatprep.subr.mxu1 %v19_v5  ;;  %335 = vmatpush3.msra.mxu0 %v20_v4 }
   0xb   :  { %359 = vmatpush3.msra.mxu1 %v19_v5  ;;  %336 = vmatprep.subr.mxu0 %v19_v5 }
   0xc   :  { %360 = vmatprep.subr.mxu1 %v18_v6  ;;  %337 = vmatpush3.msra.mxu0 %v19_v5 }
   0xd   :  { %361 = vmatpush3.msra.mxu1 %v18_v6  ;;  %338 = vmatprep.subr.mxu0 %v18_v6 }
   0xe   :  { %362 = vmatprep.subr.mxu1 %v17_v7  ;;  %339 = vmatpush3.msra.mxu0 %v18_v6 }
   0xf   :  { %363 = vmatpush3.msra.mxu1 %v17_v7  ;;  %340 = vmatprep.subr.mxu0 %v17_v7 }
  0x10   :  { %364 = vmatprep.subr.mxu1 %v16_v8  ;;  %341 = vmatpush3.msra.mxu0 %v17_v7 }
  0x11   :  { %365 = vmatpush3.msra.mxu1 %v16_v8  ;;  %342 = vmatprep.subr.mxu0 %v16_v8 }
  0x12   :  { %367 = vmatmul.mubr.msk.f32.vlgmr.msra.gmra.mxu1 %vm28_vm0, %v127_v9  ;;  %343 = vmatpush3.msra.mxu0 %v16_v8 }
  0x13   :  { %369 = vmatprep.mubr.msk.f32.mxu1 %vm28_vm0, %v128_v10  ;;  %344 = vmatprep.mubr.msk.f32.mxu0 %vm28_vm0, %v24_v11 }
  0x14   :  { %345 = vmatmul.mubr.msk.f32.vlgmr.msra.gmra.mxu0 %vm28_vm0, %v25_v12 }
  0x15   :  { %347 = vmatprep.mubr.msk.f32.mxu0 %vm28_vm0, %v26_v13 }
  0x16   :  { %370 = vmatmul.mubr.msk.f32.gmra.mxu1 %vm28_vm0, %v129_v14 }
  0x18   :  { %348 = vmatmul.mubr.msk.f32.gmra.mxu0 %vm28_vm0, %v27_v15 }
  0xd2   :  { %v368_v16 = vpop.f32.mrf.mxu1 }
  0xd3   :  { %v301_v17 = vmul.f32 -1.442695, %v368_v16 }
  0xd4   :  { %v208_v18 = vpop.f32.mrf.mxu1  ;;  %v346_v32 = vpop.f32.mrf.mxu0 }
  0xd5   :  { %372 = vpow2.f32 %v301_v17  ;;  %v300_v19 = vmul.f32 -1.442695, %v208_v18 }
  0xd6   :  { %v371_v20 = vpop.f32.mrf.mxu1  ;;  %v107_v34 = vpop.f32.mrf.mxu0 }
  0xd7   :  { %374 = vpow2.f32 %v300_v19  ;;  %v303_v21 = vmul.f32 -1.442695, %v371_v20 }
  0xd8   :  { %v218_v22 = vpop.f32.mrf.mxu1  ;;  %v349_v37 = vpop.f32.mrf.mxu0 }
  0xd9   :  { %376 = vpow2.f32 %v303_v21  ;;  %v302_v23 = vmul.f32 -1.442695, %v218_v22 }
  0xda   :  { %v117_v43 = vpop.f32.mrf.mxu0 }
  0xdb   :  { %378 = vpow2.f32 %v302_v23 }
  0xe2   :  { %v373_v24 = vpop.eup %372 }
  0xe3   :  { %v240_v25 = vadd.f32 1.0, %v373_v24 }
  0xe4   :  { %v375_v26 = vpop.eup %374 }
  0xe5   :  { %380 = vrcp.f32 %v240_v25  ;;  %v239_v27 = vadd.f32 1.0, %v375_v26 }
  0xe6   :  { %v377_v28 = vpop.eup %376 }
  0xe7   :  { %382 = vrcp.f32 %v239_v27  ;;  %v242_v29 = vadd.f32 1.0, %v377_v28 }
  0xe8   :  { %v379_v30 = vpop.eup %378 }
  0xe9   :  { %384 = vrcp.f32 %v242_v29  ;;  %v241_v31 = vadd.f32 1.0, %v379_v30 }
  0xeb   :  { %386 = vrcp.f32 %v241_v31 }
  0xf2   :  { %v381_v33 = vpop.eup %380 }
  0xf3   :  { %v252_v35 = vmul.f32 %v381_v33, %v346_v32 }
  0xf4   :  { %v383_v36 = vpop.eup %382 }
  0xf5   :  { %257 = vadd.xlane.f32.xlu0 %v252_v35  ;;  %v269_v38 = vmul.f32 %v252_v35, %v252_v35  ;;  %v251_v40 = vmul.f32 %v383_v36, %v107_v34 }
  0xf6   :  { %v385_v39 = vpop.eup %384 }
  0xf7   :  { %v254_v41 = vmul.f32 %v385_v39, %v349_v37  ;;  %274 = vadd.xlane.f32.xlu1 %v269_v38  ;;  %v268_v45 = vmul.f32 %v251_v40, %v251_v40 }
  0xf8   :  { %v387_v42 = vpop.eup %386 }
  0xf9   :  { %255 = vadd.xlane.f32.xlu0 %v251_v40  ;;  %v253_v44 = vmul.f32 %v387_v42, %v117_v43  ;;  %v271_v47 = vmul.f32 %v254_v41, %v254_v41 }
  0xfb   :  { %261 = vadd.xlane.f32.xlu1 %v254_v41  ;;  %v270_v46 = vmul.f32 %v253_v44, %v253_v44 }
  0xfd   :  { %272 = vadd.xlane.f32.xlu0 %v268_v45 }
  0xff   :  { %259 = vadd.xlane.f32.xlu1 %v253_v44 }
 0x101   :  { %276 = vadd.xlane.f32.xlu0 %v270_v46 }
 0x103   :  { %278 = vadd.xlane.f32.xlu1 %v271_v47 }
 0x17e   :  { %v258_v48 = vpop.xlane.xlu0 %257 }
 0x17f   :  { %265 = vst.msk [vmem:[%s504_s3 + $0x8] sm:$0xff] %vm263_vm1, %v258_v48 }
 0x180   :  { %v275_v49 = vpop.xlane.xlu1 %274 }
 0x181   :  { %281 = vst.msk [vmem:[%s505_s4 + $0x8] sm:$0xff] %vm263_vm1, %v275_v49 }
 0x182   :  { %v256_v50 = vpop.xlane.xlu0 %255 }
 0x183   :  { %264 = vst.msk [vmem:[%s504_s3] sm:$0xff] %vm263_vm1, %v256_v50 }
 0x184   :  { %v262_v51 = vpop.xlane.xlu1 %261 }
 0x185   :  { %267 = vst.msk [vmem:[%s504_s3 + $0x18] sm:$0xff] %vm263_vm1, %v262_v51 }
 0x186   :  { %v273_v52 = vpop.xlane.xlu0 %272 }
 0x187   :  { %280 = vst.msk [vmem:[%s505_s4] sm:$0xff] %vm263_vm1, %v273_v52 }
 0x188   :  { %v260_v53 = vpop.xlane.xlu1 %259 }
 0x189   :  { %266 = vst.msk [vmem:[%s504_s3 + $0x10] sm:$0xff] %vm263_vm1, %v260_v53 }
 0x18a   :  { %v277_v54 = vpop.xlane.xlu0 %276 }
 0x18b   :  { %282 = vst.msk [vmem:[%s505_s4 + $0x10] sm:$0xff] %vm263_vm1, %v277_v54 }
 0x18c   :  { %v279_v55 = vpop.xlane.xlu1 %278 }
 0x18d   :  { %283 = vst.msk [vmem:[%s505_s4 + $0x18] sm:$0xff] %vm263_vm1, %v279_v55 }

// kernel: output_layer_forward.3
= control target key start
LH: loop header
LB: loop body
LE: loop exit
PB: predicated region body
PF: predicated region fallthrough
CT: control target
= control target key end

     0   :  { %vm40_vm0 = vcmask 523264   ;;  %vm295_vm1 = vcmask 261120   ;;  %v671_v17 = vmov 0   ;;  %v672_v55 = vmov 0.0   ;;  %s808_s0 = inlined_call_operand.vmem [shape: f32[64,128], index: 0, kind: input, shape index: {}]   ;;  %s809_s2 = inlined_call_operand.vmem [shape: f32[32,64], index: 2, kind: input, shape index: {}]   ;;  %s810_s1 = inlined_call_operand.vmem [shape: f32[32,64], index: 1, kind: input, shape index: {}]   ;;  %s811_s3 = inlined_call_operand.vmem [shape: f32[32,32], index: 3, kind: input, shape index: {}]   ;;  %s812_s4 = inlined_call_operand.vmem [shape: f32[32,1], index: 4, kind: input, shape index: {}]   ;;  %s813_s6 = inlined_call_operand.<no memory space> [shape: f32[1,1], index: 6, kind: input, shape index: {}]   ;;  %s814_s5 = inlined_call_operand.vmem [shape: f32[8,32], index: 5, kind: input, shape index: {}]   ;;  %s815_s7 = inlined_call_operand.vmem [shape: f32[8,128], index: 7, kind: output, shape index: {}]  }
   0x1   :  { %v35_v0 = vld [vmem:[%s808_s0 + $0x38] sm:$0xff]  ;;  %v34_v1 = vld [vmem:[%s808_s0 + $0x30] sm:$0xff]  ;;  %v33_v2 = vld [vmem:[%s808_s0 + $0x28] sm:$0xff]  ;;  %637 = vset.pattern.permute.xlu0 %v671_v17  ;;  %638 = vset.pattern.permute.xlu1 %v671_v17  ;;  %v12_v20 = vstv %s813_s6  ;;  %vm673_vm2 = vmmov 0  }
   0x2   :  { %587 = vmatprep.subr.mxu1 %v35_v0  ;;  %565 = vmatprep.subr.mxu0 %v35_v0  ;;  %v138_v3 = vld [vmem:[%s809_s2] sm:$0xff]  ;;  %v31_v5 = vld [vmem:[%s808_s0 + $0x18] sm:$0xff]  ;;  %v30_v6 = vld [vmem:[%s808_s0 + $0x10] sm:$0xff]  ;;  %13 = vst [vmem:[#allocation2] sm:$0x1] %v12_v20 }
   0x3   :  { %588 = vmatpush3.msra.mxu1 %v35_v0  ;;  %566 = vmatpush3.msra.mxu0 %v35_v0  ;;  %v32_v4 = vld [vmem:[%s808_s0 + $0x20] sm:$0xff]  ;;  %v29_v7 = vld [vmem:[%s808_s0 + $0x8] sm:$0xff]  ;;  %v140_v10 = vld [vmem:[%s809_s2 + $0x10] sm:$0xff] }
   0x4   :  { %589 = vmatprep.subr.mxu1 %v34_v1  ;;  %603 = vmatprep.mubr.msk.f32.mxu1 %vm40_vm0, %v138_v3  ;;  %v28_v8 = vld [vmem:[%s808_s0] sm:$0xff]  ;;  %v139_v9 = vld [vmem:[%s809_s2 + $0x8] sm:$0xff]  ;;  %v38_v13 = vld [vmem:[%s810_s1 + $0x10] sm:$0xff] }
   0x5   :  { %590 = vmatpush3.msra.mxu1 %v34_v1  ;;  %567 = vmatprep.subr.mxu0 %v34_v1  ;;  %v36_v11 = vld [vmem:[%s810_s1] sm:$0xff]  ;;  %v37_v12 = vld [vmem:[%s810_s1 + $0x8] sm:$0xff]  ;;  %v141_v14 = vld [vmem:[%s809_s2 + $0x18] sm:$0xff] }
   0x6   :  { %591 = vmatprep.subr.mxu1 %v33_v2  ;;  %568 = vmatpush3.msra.mxu0 %v34_v1  ;;  %v39_v15 = vld [vmem:[%s810_s1 + $0x18] sm:$0xff]  ;;  %v267_v16 = vld [vmem:[%s811_s3] sm:$0xff]  ;;  %v272_v19 = vld [vmem:[%s812_s4 + $0x8] sm:$0xff] }
   0x7   :  { %592 = vmatpush3.msra.mxu1 %v33_v2  ;;  %569 = vmatprep.subr.mxu0 %v33_v2  ;;  %v274_v18 = vld [vmem:[%s812_s4 + $0x18] sm:$0xff]  ;;  %v273_v21 = vld [vmem:[%s812_s4 + $0x10] sm:$0xff]  ;;  %v271_v22 = vld [vmem:[%s812_s4] sm:$0xff] }
   0x8   :  { %593 = vmatprep.subr.mxu1 %v32_v4  ;;  %570 = vmatpush3.msra.mxu0 %v33_v2  ;;  %v268_v52 = vld [vmem:[%s811_s3 + $0x8] sm:$0xff]  ;;  %v269_v53 = vld [vmem:[%s811_s3 + $0x10] sm:$0xff]  ;;  %v270_v54 = vld [vmem:[%s811_s3 + $0x18] sm:$0xff] }
   0x9   :  { %594 = vmatpush3.msra.mxu1 %v32_v4  ;;  %571 = vmatprep.subr.mxu0 %v32_v4  ;;  %v526_v23 = vld [vmem:[#allocation2] ss:$0 sm:$0xff] }
   0xa   :  { %595 = vmatprep.subr.mxu1 %v31_v5  ;;  %572 = vmatpush3.msra.mxu0 %v32_v4 }
   0xb   :  { %596 = vmatpush3.msra.mxu1 %v31_v5  ;;  %573 = vmatprep.subr.mxu0 %v31_v5 }
   0xc   :  { %597 = vmatprep.subr.mxu1 %v30_v6  ;;  %574 = vmatpush3.msra.mxu0 %v31_v5 }
   0xd   :  { %598 = vmatpush3.msra.mxu1 %v30_v6  ;;  %575 = vmatprep.subr.mxu0 %v30_v6 }
   0xe   :  { %599 = vmatprep.subr.mxu1 %v29_v7  ;;  %576 = vmatpush3.msra.mxu0 %v30_v6 }
   0xf   :  { %600 = vmatpush3.msra.mxu1 %v29_v7  ;;  %577 = vmatprep.subr.mxu0 %v29_v7 }
  0x10   :  { %601 = vmatprep.subr.mxu1 %v28_v8  ;;  %578 = vmatpush3.msra.mxu0 %v29_v7 }
  0x11   :  { %602 = vmatpush3.msra.mxu1 %v28_v8  ;;  %579 = vmatprep.subr.mxu0 %v28_v8 }
  0x12   :  { %604 = vmatmul.mubr.msk.f32.vlgmr.msra.gmra.mxu1 %vm40_vm0, %v139_v9  ;;  %580 = vmatpush3.msra.mxu0 %v28_v8 }
  0x13   :  { %606 = vmatprep.mubr.msk.f32.mxu1 %vm40_vm0, %v140_v10  ;;  %581 = vmatprep.mubr.msk.f32.mxu0 %vm40_vm0, %v36_v11 }
  0x14   :  { %582 = vmatmul.mubr.msk.f32.vlgmr.msra.gmra.mxu0 %vm40_vm0, %v37_v12  ;;  %292 = vperm.xlu0 %637, %v274_v18  }
  0x15   :  { %584 = vmatprep.mubr.msk.f32.mxu0 %vm40_vm0, %v38_v13  ;;  %282 = vperm.xlu1 %638, %v272_v19   ;;  %v417_v19 = vld [vmem:[%s814_s5] sm:$0xff] }
  0x16   :  { %607 = vmatmul.mubr.msk.f32.gmra.mxu1 %vm40_vm0, %v141_v14  ;;  %623 = vmatprep.subr.mxu1 %v672_v55 }
  0x17   :  { %631 = vmatprep.mubr.msk.f32.mxu1 %vm673_vm2, %v672_v55 }
  0x18   :  { %585 = vmatmul.mubr.msk.f32.gmra.mxu0 %vm40_vm0, %v39_v15  ;;  %287 = vperm.xlu0 %637, %v273_v21  }
  0x19   :  { %617 = vmatprep.mubr.msk.f32.mxu0 %vm295_vm1, %v267_v16  ;;  %277 = vperm.xlu1 %638, %v271_v22  }
  0x1c   :  { %425 = vperm.xlu0 %637, %v526_v23  }
  0x8f   :  { %v293_v57 = vpop.permute.xlu0 %292 }
  0x90   :  { %v283_v56 = vpop.permute.xlu1 %282 }
  0x93   :  { %v288_v2 = vpop.permute.xlu0 %287 }
  0x94   :  { %v278_v59 = vpop.permute.xlu1 %277 }
  0x97   :  { %v426_v21 = vpop.permute.xlu0 %425 }
  0xd2   :  { %v605_v24 = vpop.f32.mrf.mxu1 }
  0xd3   :  { %v515_v25 = vmul.f32 -1.442695, %v605_v24 }
  0xd4   :  { %v220_v26 = vpop.f32.mrf.mxu1  ;;  %v583_v40 = vpop.f32.mrf.mxu0 }
  0xd5   :  { %v514_v27 = vmul.f32 -1.442695, %v220_v26  ;;  %639 = vpow2.f32 %v515_v25 }
  0xd6   :  { %v608_v28 = vpop.f32.mrf.mxu1  ;;  %v119_v41 = vpop.f32.mrf.mxu0 }
  0xd7   :  { %v517_v29 = vmul.f32 -1.442695, %v608_v28  ;;  %641 = vpow2.f32 %v514_v27 }
  0xd8   :  { %v230_v30 = vpop.f32.mrf.mxu1  ;;  %v586_v42 = vpop.f32.mrf.mxu0 }
  0xd9   :  { %643 = vpow2.f32 %v517_v29  ;;  %v516_v31 = vmul.f32 -1.442695, %v230_v30 }
  0xda   :  { %v129_v47 = vpop.f32.mrf.mxu0 }
  0xdb   :  { %645 = vpow2.f32 %v516_v31 }
  0xe2   :  { %v640_v32 = vpop.eup %639 }
  0xe3   :  { %v252_v35 = vadd.f32 1.0, %v640_v32 }
  0xe4   :  { %v642_v33 = vpop.eup %641 }
  0xe5   :  { %v251_v38 = vadd.f32 1.0, %v642_v33 }
  0xe6   :  { %v644_v34 = vpop.eup %643 }
  0xe7   :  { %v254_v36 = vadd.f32 1.0, %v644_v34 }
  0xe8   :  { %v646_v37 = vpop.eup %645 }
  0xe9   :  { %647 = vrcp.f32 %v254_v36  ;;  %v253_v39 = vadd.f32 1.0, %v646_v37 }
  0xea   :  { %649 = vrcp.f32 %v252_v35 }
  0xeb   :  { %651 = vrcp.f32 %v253_v39 }
  0xec   :  { %653 = vrcp.f32 %v251_v38 }
  0xf6   :  { %v648_v43 = vpop.eup %647 }
  0xf7   :  { %v650_v44 = vpop.eup %649  ;;  %v266_v45 = vmul.f32 %v648_v43, %v586_v42 }
  0xf8   :  { %v652_v46 = vpop.eup %651  ;;  %v264_v50 = vmul.f32 %v650_v44, %v583_v40 }
  0xf9   :  { %v265_v48 = vmul.f32 %v652_v46, %v129_v47  ;;  %609 = vmatprep.subr.mxu0 %v266_v45  ;;  %v654_v49 = vpop.eup %653 }
  0xfa   :  { %610 = vmatpush3.msra.mxu0 %v266_v45  ;;  %v263_v51 = vmul.f32 %v654_v49, %v119_v41 }
  0xfb   :  { %611 = vmatprep.subr.mxu0 %v265_v48 }
  0xfc   :  { %612 = vmatpush3.msra.mxu0 %v265_v48 }
  0xfd   :  { %613 = vmatprep.subr.mxu0 %v264_v50 }
  0xfe   :  { %614 = vmatpush3.msra.mxu0 %v264_v50 }
  0xff   :  { %615 = vmatprep.subr.mxu0 %v263_v51 }
 0x100   :  { %616 = vmatpush3.msra.mxu0 %v263_v51 }
 0x101   :  { %618 = vmatmul.mubr.msk.f32.vlgmr.msra.gmra.mxu0 %vm295_vm1, %v268_v52 }
 0x102   :  { %620 = vmatprep.mubr.msk.f32.mxu0 %vm295_vm1, %v269_v53 }
 0x105   :  { %621 = vmatmul.mubr.msk.f32.gmra.mxu0 %vm295_vm1, %v270_v54 }
 0x1c1   :  { %v619_v58 = vpop.f32.mrf.mxu0 }
 0x1c2   :  { %v380_v60 = vadd.f32 %v619_v58, %v283_v56 }
 0x1c3   :  { %v374_v61 = vpop.f32.mrf.mxu0 }
 0x1c4   :  { %v375_v62 = vadd.f32 %v374_v61, %v278_v59  ;;  %v523_v63 = vmul.f32 -1.442695, %v380_v60 }
 0x1c5   :  { %v622_v0 = vpop.f32.mrf.mxu0 }
 0x1c6   :  { %v390_v1 = vadd.f32 %v622_v0, %v293_v57  ;;  %v522_v3 = vmul.f32 -1.442695, %v375_v62  ;;  %655 = vpow2.f32 %v523_v63 }
 0x1c7   :  { %v384_v4 = vpop.f32.mrf.mxu0 }
 0x1c8   :  { %v525_v5 = vmul.f32 -1.442695, %v390_v1  ;;  %v385_v6 = vadd.f32 %v384_v4, %v288_v2 }
 0x1ca   :  { %657 = vpow2.f32 %v525_v5  ;;  %v524_v7 = vmul.f32 -1.442695, %v385_v6 }
 0x1cb   :  { %659 = vpow2.f32 %v522_v3 }
 0x1cc   :  { %661 = vpow2.f32 %v524_v7 }
 0x1d3   :  { %v656_v8 = vpop.eup %655 }
 0x1d4   :  { %v406_v13 = vadd.f32 1.0, %v656_v8 }
 0x1d7   :  { %v658_v9 = vpop.eup %657 }
 0x1d8   :  { %v660_v10 = vpop.eup %659  ;;  %v408_v11 = vadd.f32 1.0, %v658_v9 }
 0x1d9   :  { %v662_v12 = vpop.eup %661  ;;  %v405_v15 = vadd.f32 1.0, %v660_v10 }
 0x1da   :  { %663 = vrcp.f32 %v408_v11  ;;  %v407_v14 = vadd.f32 1.0, %v662_v12 }
 0x1dc   :  { %665 = vrcp.f32 %v407_v14 }
 0x1dd   :  { %667 = vrcp.f32 %v406_v13 }
 0x1de   :  { %669 = vrcp.f32 %v405_v15 }
 0x1e7   :  { %v664_v16 = vpop.eup %663 }
 0x1e8   :  { %624 = vmatpush3.msra.mxu1 %v664_v16 }
 0x1e9   :  { %v666_v17 = vpop.eup %665  ;;  %625 = vmatprep.subr.mxu1 %v672_v55 }
 0x1ea   :  { %626 = vmatpush3.msra.mxu1 %v666_v17  ;;  %v668_v18 = vpop.eup %667 }
 0x1eb   :  { %627 = vmatprep.subr.mxu1 %v672_v55  ;;  %v670_v20 = vpop.eup %669 }
 0x1ec   :  { %628 = vmatpush3.msra.mxu1 %v668_v18 }
 0x1ed   :  { %629 = vmatprep.subr.mxu1 %v672_v55 }
 0x1ee   :  { %630 = vmatpush3.msra.mxu1 %v670_v20 }
 0x1ef   :  { %632 = vmatmul.mubr.msk.f32.vlgmr.msra.gmra.mxu1 %vm295_vm1, %v417_v19 }
 0x2af   :  { %v497_v22 = vpop.f32.mrf.mxu1 }
 0x2b0   :  { %v498_v23 = vadd.f32 %v497_v22, %v426_v21 }
 0x2b1   :  { %v633_v24 = vpop.f32.mrf.mxu1 }
 0x2b2   :  { %501 = vst [vmem:[%s815_s7] sm:$0xff] %v498_v23 }

</bundles_post_ra>
